<compile_context>
chip_gen: v7x
topology: tpu7x:2x2x1
jax: 0.10.0
libtpu: 0.0.40
codegen_flags: <defaults>
</compile_context>

<pallas_src>
import functools

import jax
import jax.numpy as jnp
from jax.experimental import pallas as pl
from jax.experimental.pallas import tpu as pltpu


def _round_up(x, m):
    return (x + m - 1) // m * m


def _vmem_info():
    """Generation-aware VMEM capacity + working-set budget."""
    cap = 64 << 20  # safe fallback (v7x physical)
    try:
        info = pltpu.get_tpu_info()
        cap = int(getattr(info, "vmem_capacity_bytes", cap)) or cap
    except Exception:
        pass
    budget = max(16 << 20, int(cap * 0.70))  # ~45 MiB on v7x, ~90 MiB on v5e/v6e
    return cap, budget


def _choose_tiles(d_in, d_out, *, block_b, tn, tk, budget):
    """Pick MXU/lane-aligned (block_b, tn, tk) tiles within the VMEM budget."""
    d_out_p = _round_up(d_out, 128)

    tn = max(128, min(_round_up(tn, 128), d_out_p))
    if tn < d_out_p and tn >= 256:
        tn = (tn // 256) * 256  # MXU-edge aligned when actually tiling N

    # K axis: keep the whole reduction in one tile when it is small enough; otherwise
    # tile it in 256-aligned chunks (K padding is zeros -> contributes nothing).
    if d_in <= max(tk, 256):
        tk = d_in
    else:
        tk = max(256, (min(tk, d_in) // 256) * 256)

    block_b = max(16, _round_up(block_b, 16))
    if block_b >= 256:
        block_b = (block_b // 256) * 256

    def ws(bb, nn, kk):
        multi_k = kk < d_in
        return (2 * bb * kk * 2                      # x tile, double-buffered bf16
                + 2 * kk * nn * 2                    # W tile, double-buffered bf16
                + 2 * nn * 4                         # bias tile f32
                + 2 * bb * nn * 4                    # out tile, double-buffered f32
                + (bb * nn * 4 if multi_k else 0))   # f32 accumulator scratch

    # Shrink K first, then N, then batch, keeping MXU/lane alignment.
    while tk < d_in and tk > 256 and ws(block_b, tn, tk) > budget:
        tk -= 256
    while tn > 256 and ws(block_b, tn, tk) > budget:
        tn -= 256
    while tn > 128 and ws(block_b, tn, tk) > budget:
        tn -= 128
    while block_b > 256 and ws(block_b, tn, tk) > budget:
        block_b -= 256
    while block_b > 16 and ws(block_b, tn, tk) > budget:
        block_b = max(16, _round_up(block_b // 2, 16))

    # Correctness: make tn divide the 128-padded output width so no columns are dropped.
    while tn > 128 and d_out_p % tn != 0:
        tn -= 128

    return block_b, tn, tk, ws(block_b, tn, tk)


def _linear_relu_kernel(x_ref, w_ref, b_ref, o_ref):
    # Single-K-tile fast path: MXU matmul (bf16 in, f32 acc) + bias + ReLU, straight to o_ref.
    y = jnp.dot(x_ref[...], w_ref[...], preferred_element_type=jnp.float32)
    o_ref[...] = jnp.maximum(y + b_ref[...], 0.0).astype(o_ref.dtype)


def _linear_relu_ktiled_kernel(x_ref, w_ref, b_ref, o_ref, acc_ref):
    # K-tiled path: f32 VMEM accumulator, bias + ReLU epilogue on the last K step.
    k = pl.program_id(2)

    @pl.when(k == 0)
    def _():
        acc_ref[...] = jnp.zeros_like(acc_ref)

    acc_ref[...] += jnp.dot(x_ref[...], w_ref[...], preferred_element_type=jnp.float32)

    @pl.when(k == pl.num_programs(2) - 1)
    def _():
        o_ref[...] = jnp.maximum(acc_ref[...] + b_ref[...], 0.0).astype(o_ref.dtype)


@functools.partial(
    jax.jit, static_argnames=("block_b", "tn", "tk", "d_out", "vmem_limit"))
def _block_ae_forward(x, w_bf, b2d, *, block_b, tn, tk, d_out, vmem_limit):
    batch, d_in = x.shape
    d_in_p, d_out_p = w_bf.shape
    num_n = d_out_p // tn
    num_k = d_in_p // tk

    # Per-call batch tiling: split the batch into num_b tiles of 16-aligned rows
    # (minimizes zero-padding instead of always rounding up to the full block).
    num_b = -(-batch // block_b)
    block_b = _round_up(-(-batch // num_b), 16)
    batch_p = block_b * num_b

    out_dtype = x.dtype
    if batch_p != batch or d_in_p != d_in:
        x = jnp.pad(x, ((0, batch_p - batch), (0, d_in_p - d_in)))
    x_bf = x.astype(jnp.bfloat16)  # only x padded/cast per call; W/b prepared once at init

    x_bytes = batch_p * d_in_p * 2
    w_bytes = d_in_p * d_out_p * 2

    # Single-buffer (resident) specs whose block index is constant over the whole grid.
    resident_w = {"pipeline_mode": pl.Buffered(1)} if (num_n == 1 and num_k == 1) else {}
    resident_x = {"pipeline_mode": pl.Buffered(1)} if (num_b == 1 and num_k == 1) else {}

    if num_k == 1:
        # Grid order that minimizes duplicated HBM reads of the re-streamed operand.
        batch_inner = (num_n - 1) * x_bytes <= (num_b - 1) * w_bytes
        if batch_inner:   # grid (n, b): W read once, x read num_n times
            grid = (num_n, num_b)
            x_map, w_map = (lambda n, b: (b, 0)), (lambda n, b: (0, n))
            bias_map, o_map = (lambda n, b: (0, n)), (lambda n, b: (b, n))
        else:             # grid (b, n): x read once, W read num_b times
            grid = (num_b, num_n)
            x_map, w_map = (lambda b, n: (b, 0)), (lambda b, n: (0, n))
            bias_map, o_map = (lambda b, n: (0, n)), (lambda b, n: (b, n))
        dims = ("parallel", "parallel")
        scratch = []
        kernel = _linear_relu_kernel
        x_reads = num_n if batch_inner else 1
        w_reads = 1 if batch_inner else num_b
    else:
        grid = (num_n, num_b, num_k)  # K innermost, reduction into VMEM accumulator
        x_map, w_map = (lambda n, b, k: (b, k)), (lambda n, b, k: (k, n))
        bias_map, o_map = (lambda n, b, k: (0, n)), (lambda n, b, k: (b, n))
        dims = ("parallel", "parallel", "arbitrary")
        scratch = [pltpu.VMEM((block_b, tn), jnp.float32)]
        kernel = _linear_relu_ktiled_kernel
        x_reads, w_reads = num_n, num_b

    cost = pl.CostEstimate(
        flops=2 * batch_p * d_in_p * d_out_p,
        transcendentals=0,
        bytes_accessed=(x_reads * x_bytes + w_reads * w_bytes
                        + d_out_p * 4 + batch_p * d_out_p * 4),
    )

    out_p = pl.pallas_call(
        kernel,
        out_shape=jax.ShapeDtypeStruct((batch_p, d_out_p), out_dtype),
        grid_spec=pltpu.PrefetchScalarGridSpec(
            num_scalar_prefetch=0,
            grid=grid,
            in_specs=[
                pl.BlockSpec((block_b, tk), x_map, **resident_x),   # x tile (bf16)
                pl.BlockSpec((tk, tn), w_map, **resident_w),        # weight tile (bf16)
                pl.BlockSpec((1, tn), bias_map, **resident_w),      # bias tile (f32)
            ],
            out_specs=pl.BlockSpec((block_b, tn), o_map),
            scratch_shapes=scratch,
        ),
        compiler_params=pltpu.CompilerParams(
            dimension_semantics=dims,
            vmem_limit_bytes=vmem_limit,
        ),
        cost_estimate=cost,
    )(x_bf, w_bf, b2d)

    return out_p[:batch, :d_out]


class BlockAEPallas:
    """BlockAE.forward = ReLU(Linear(x)) with the Linear parameters prepared once.

    Pass the PyTorch Linear weight pre-transposed: w_t has shape (in, out).
    Padding to lane-aligned shapes and the bf16 cast of W / b happen here, once,
    so repeated forward calls only pad/cast x.
    """

    def __init__(self, w_t, b, *, block_b=256, tn=512, tk=1024):
        d_in, d_out = w_t.shape
        cap, budget = _vmem_info()
        block_b, tn, tk, ws = _choose_tiles(
            d_in, d_out, block_b=block_b, tn=tn, tk=tk, budget=budget)

        d_out_p = _round_up(d_out, 128)                 # tn divides this by construction
        d_in_p = d_in if tk == d_in else _round_up(d_in, tk)

        w_p = w_t
        if (d_in_p, d_out_p) != (d_in, d_out):
            w_p = jnp.pad(w_t, ((0, d_in_p - d_in), (0, d_out_p - d_out)))
        b_p = jnp.pad(b, (0, d_out_p - d_out)) if d_out_p != d_out else b

        self.w_bf = jnp.asarray(w_p, jnp.bfloat16)      # hoisted one-time pad + cast
        self.b2d = jnp.asarray(b_p, jnp.float32).reshape(1, d_out_p)
        self.d_out = int(d_out)
        self.block_b, self.tn, self.tk = int(block_b), int(tn), int(tk)
        self.vmem_limit = int(min(int(cap * 0.9), max(32 << 20, int(1.5 * ws))))

    def __call__(self, x):
        return _block_ae_forward(
            x, self.w_bf, self.b2d,
            block_b=self.block_b, tn=self.tn, tk=self.tk,
            d_out=self.d_out, vmem_limit=self.vmem_limit)


def init_params(key, input_dim, output_dim):
    """Deterministic init mimicking torch.nn.Linear (uniform(-1/sqrt(in), 1/sqrt(in)))."""
    kw, kb = jax.random.split(key)
    bound = 1.0 / jnp.sqrt(jnp.float32(input_dim))
    # PyTorch Linear weight is (out, in); we store the transpose (in, out).
    w_t = jax.random.uniform(
        kw, (input_dim, output_dim), jnp.float32, minval=-bound, maxval=bound)
    b = jax.random.uniform(
        kb, (output_dim,), jnp.float32, minval=-bound, maxval=bound)
    return w_t, b


def _reference_bf16(x, w_t, b):
    # Same math as the kernel: bf16 inputs, f32 accumulation, f32 bias + ReLU.
    y = jnp.dot(x.astype(jnp.bfloat16), w_t.astype(jnp.bfloat16),
                preferred_element_type=jnp.float32)
    return jnp.maximum(y + b[None, :], 0.0)


if __name__ == "__main__":
    # 1) Shapes consistent with BlockAE(input_dim=32, output_dim=64, nn.ReLU), batch=8.
    k_x, k_p = jax.random.split(jax.random.PRNGKey(0))
    batch, d_in, d_out = 8, 32, 64
    x = jax.random.normal(k_x, (batch, d_in), jnp.float32)
    w_t, b = init_params(k_p, d_in, d_out)
    mod = BlockAEPallas(w_t, b)
    out = jax.block_until_ready(mod(x))
    assert out.shape == (batch, d_out)
    assert jnp.allclose(out, _reference_bf16(x, w_t, b), atol=1e-3, rtol=1e-3)
    # Loose sanity vs full-f32 math of the PyTorch module (bf16 inputs on the MXU path).
    assert jnp.allclose(out, jnp.maximum(x @ w_t + b[None, :], 0.0), atol=5e-2, rtol=5e-2)

    # 2) Ragged batch, non-multiple-of-128 D_in, single resident N tile.
    k2x, k2p = jax.random.split(jax.random.PRNGKey(1))
    x2 = jax.random.normal(k2x, (20, 48), jnp.float32)
    w2, b2 = init_params(k2p, 48, 384)
    mod2 = BlockAEPallas(w2, b2, block_b=32, tn=512)
    out2 = jax.block_until_ready(mod2(x2))
    assert out2.shape == (20, 384)
    assert jnp.allclose(out2, _reference_bf16(x2, w2, b2), atol=1e-3, rtol=1e-3)

    # 3) K-tiled path (num_k=2), multiple N/batch tiles, remainder D_out columns (600 -> 640).
    k3x, k3p = jax.random.split(jax.random.PRNGKey(2))
    x3 = jax.random.normal(k3x, (40, 512), jnp.float32)
    w3, b3 = init_params(k3p, 512, 600)
    mod3 = BlockAEPallas(w3, b3, block_b=16, tn=512, tk=256)
    out3 = jax.block_until_ready(mod3(x3))
    assert out3.shape == (40, 600)
    assert jnp.allclose(out3, _reference_bf16(x3, w3, b3), atol=2e-3, rtol=2e-3)

    print("KERNEL_OK")
</pallas_src>

<mosaic_0001>
module attributes {stable_mosaic.version = 11 : i64} {
  func.func @_linear_relu_kernel(%arg0: i32, %arg1: i32, %arg2: memref<16x32xbf16, #tpu.memory_space<vmem>>, %arg3: memref<32x128xbf16, #tpu.memory_space<vmem>>, %arg4: memref<1x128xf32, #tpu.memory_space<vmem>>, %arg5: memref<16x128xf32, #tpu.memory_space<vmem>>) attributes {dimension_semantics = [#tpu.dimension_semantics<parallel>, #tpu.dimension_semantics<parallel>], iteration_bounds = array<i64: 1, 1>, scalar_prefetch = 0 : i64, scratch_operands = 0 : i64, tpu.core_type = #tpu.core_type<tc>, window_params = [{pipeline_mode = #tpu.pipeline_mode<synchronous>, transform_indices = @transform_0, window_bounds = array<i64: 16, 32>}, {pipeline_mode = #tpu.pipeline_mode<synchronous>, transform_indices = @transform_1, window_bounds = array<i64: 32, 128>}, {pipeline_mode = #tpu.pipeline_mode<synchronous>, transform_indices = @transform_2, window_bounds = array<i64: 1, 128>}, {transform_indices = @transform_3, window_bounds = array<i64: 16, 128>}]} {
    %c0 = arith.constant 0 : index
    %c0_0 = arith.constant 0 : index
    %0 = vector.load %arg2[%c0, %c0_0] : memref<16x32xbf16, #tpu.memory_space<vmem>>, vector<16x32xbf16>
    %c0_1 = arith.constant 0 : index
    %c0_2 = arith.constant 0 : index
    %1 = vector.load %arg3[%c0_1, %c0_2] : memref<32x128xbf16, #tpu.memory_space<vmem>>, vector<32x128xbf16>
    %cst = arith.constant dense<0.000000e+00> : vector<16x128xf32>
    %2 = tpu.matmul %0, %1, %cst {dimension_numbers = #tpu.dot_dimension_numbers<[1], [0], [0], [1], [0, 0, 1, 1], [], []>} : vector<16x32xbf16>, vector<32x128xbf16>, vector<16x128xf32> -> vector<16x128xf32>
    %c0_3 = arith.constant 0 : index
    %c0_4 = arith.constant 0 : index
    %3 = vector.load %arg4[%c0_3, %c0_4] : memref<1x128xf32, #tpu.memory_space<vmem>>, vector<1x128xf32>
    %4 = vector.broadcast %3 : vector<1x128xf32> to vector<16x128xf32>
    %5 = arith.addf %2, %4 : vector<16x128xf32>
    %cst_5 = arith.constant 0.000000e+00 : f32
    %6 = vector.broadcast %cst_5 : f32 to vector<16x128xf32>
    %7 = arith.maximumf %5, %6 : vector<16x128xf32>
    %c0_6 = arith.constant 0 : index
    %c0_7 = arith.constant 0 : index
    %8 = vector.load %arg5[%c0_6, %c0_7] : memref<16x128xf32, #tpu.memory_space<vmem>>, vector<16x128xf32>
    tpu.vector_store %arg5[%c0_6, %c0_7], %7 {strides = array<i32>} : memref<16x128xf32, #tpu.memory_space<vmem>>, vector<16x128xf32>,
    return
  }
  func.func @transform_0(%arg0: i32, %arg1: i32) -> (i32, i32) {
    %c0_i32 = arith.constant 0 : i32
    %c0_i32_0 = arith.constant 0 : i32
    return %arg1, %c0_i32 : i32, i32
  }
  func.func @transform_1(%arg0: i32, %arg1: i32) -> (i32, i32) {
    %c0_i32 = arith.constant 0 : i32
    %c0_i32_0 = arith.constant 0 : i32
    return %c0_i32, %arg0 : i32, i32
  }
  func.func @transform_2(%arg0: i32, %arg1: i32) -> (i32, i32) {
    %c0_i32 = arith.constant 0 : i32
    %c0_i32_0 = arith.constant 0 : i32
    return %c0_i32, %arg0 : i32, i32
  }
  func.func @transform_3(%arg0: i32, %arg1: i32) -> (i32, i32) {
    %c0_i32 = arith.constant 0 : i32
    return %arg1, %arg0 : i32, i32
  }
}

</mosaic_0001>

<bundles_post_ra>
// kernel: _block_ae_forward.1
= control target key start
LH: loop header
LB: loop body
LE: loop exit
PB: predicated region body
PF: predicated region fallthrough
CT: control target
= control target key end

     0   :  { %v119_v0 = vmov 0.0   ;;  %vm120_vm0 = vmmov 0   ;;  %vm45_vm1 = vcmask 261120   ;;  %s159_s1 = inlined_call_operand.vmem [shape: bf16[32,128], index: 1, kind: input, shape index: {}]   ;;  %s160_s0 = inlined_call_operand.vmem [shape: bf16[16,32], index: 0, kind: input, shape index: {}]   ;;  %s161_s2 = inlined_call_operand.vmem [shape: f32[1,128], index: 2, kind: input, shape index: {}]   ;;  %s162_s3 = inlined_call_operand.vmem [shape: f32[16,128], index: 3, kind: output, shape index: {}]  }
   0x1   :  { %106 = vmatprep.subr.bf16.mxu0 %v119_v0  ;;  %v116_v1 = vld [vmem:[%s159_s1] sm:$0xff]   ;;  %110 = vmatprep.mubr.msk.bf16.mxu0 %vm120_vm0, %v119_v0  ;;  %v117_v2 = vld [vmem:[%s159_s1 + $0x8] sm:$0xff]  }
   0x2   :  { %107 = vmatpush3.bf16.msra.mxu0 %v116_v1  ;;  %v118_v3 = vld [vmem:[%s160_s0] sm:$0xff]  }
   0x3   :  { %108 = vmatprep.subr.bf16.mxu0 %v119_v0  ;;  %v98_v4 = vld [vmem:[%s161_s2] ss:$0 sm:$0xff] }
   0x6   :  { %109 = vmatpush3.bf16.msra.mxu0 %v117_v2 }
   0x9   :  { %111 = vmatmul.mubr.msk.bf16.vlgmr.msra.gmra.mrb[0].mxu0 %vm45_vm1, %v118_v3 }
  0xdc   :  { %v83_v5 = vpop.f32.mrb[0].mxu0 }
  0xdd   :  { %v84_v6 = vadd.f32 %v98_v4, %v83_v5  ;;  %v112_v7 = vpop.f32.mrb[1].mxu0 }
  0xde   :  { %v86_v8 = vpop.f32.mrb[2].mxu0 }
  0xdf   :  { %v90_v9 = vmax.f32 %v84_v6, 0.0  ;;  %v87_v10 = vadd.f32 %v98_v4, %v86_v8  ;;  %v113_v11 = vpop.f32.mrb[3].mxu0 }
  0xe1   :  { %92 = vst [vmem:[%s162_s3] sm:$0xff] %v90_v9  ;;  %v91_v12 = vmax.f32 %v87_v10, 0.0 }
  0xe3   :  { %93 = vst [vmem:[%s162_s3 + $0x8] sm:$0xff] %v91_v12 }

</bundles_post_ra>
